<compile_context>
chip_gen: v6e
topology: v6e:2x2x1
jax: 0.10.0
libtpu: 0.0.40
codegen_flags: <defaults>
</compile_context>

<pallas_src>
import functools

import jax
import jax.numpy as jnp
from jax.experimental import pallas as pl
from jax.experimental.pallas import tpu as pltpu


def _round_up(n, m):
    return (n + m - 1) // m * m


# ---------------------------------------------------------------------------
# Pallas kernel: per-tap conv matmuls + bias + GLU (one batch element per grid step)
# ---------------------------------------------------------------------------
def _conv_glu_kernel(x_ref, wa_ref, wg_ref, ba_ref, bg_ref, o_ref):
    # x_ref : (T_pad, C_in)        f32, zero-padded in time (conv pad + 8-row round-up)
    # wa_ref: (k, C_in, C_out_pad) compute dtype (f32 or bf16)   -- "a" half of GLU
    # wg_ref: (k, C_in, C_out_pad) compute dtype                 -- gate half of GLU
    # ba_ref/bg_ref: (1, C_out_pad) f32
    # o_ref : (T_out, C_out_pad)   f32
    k = wa_ref.shape[0]
    t_out, c_out_pad = o_ref.shape
    cdt = wa_ref.dtype

    acc_a = jnp.zeros((t_out, c_out_pad), jnp.float32)
    acc_g = jnp.zeros((t_out, c_out_pad), jnp.float32)

    # Static unroll over the (tiny) kernel taps; each tap is a stride-2 sublane read of the
    # VMEM-resident activation block feeding an MXU matmul with f32 accumulation.
    for t in range(k):
        xt = x_ref[pl.ds(t, t_out, stride=2), :].astype(cdt)
        acc_a = acc_a + jnp.dot(xt, wa_ref[t], preferred_element_type=jnp.float32)
        acc_g = acc_g + jnp.dot(xt, wg_ref[t], preferred_element_type=jnp.float32)

    a = acc_a + ba_ref[...]
    g = acc_g + bg_ref[...]
    o_ref[...] = (a * jax.nn.sigmoid(g)).astype(o_ref.dtype)


def _conv_glu_layer(x_pad, wa, wg, ba, bg, t_out):
    """x_pad: (B, T_pad, C_in) f32 -> (B, T_out, C_out_pad) f32 (padded channels are 0)."""
    B, t_pad, c_in = x_pad.shape
    k = wa.shape[0]
    c_out_pad = wa.shape[2]
    return pl.pallas_call(
        _conv_glu_kernel,
        out_shape=jax.ShapeDtypeStruct((B, t_out, c_out_pad), jnp.float32),
        grid_spec=pl.GridSpec(
            grid=(B,),
            in_specs=[
                # One batch element's full time window per grid step (pipelined across b).
                pl.BlockSpec((None, t_pad, c_in), lambda b: (b, 0, 0)),
                # Weights / bias: constant block index -> fetched once, VMEM resident.
                pl.BlockSpec((k, c_in, c_out_pad), lambda b: (0, 0, 0)),
                pl.BlockSpec((k, c_in, c_out_pad), lambda b: (0, 0, 0)),
                pl.BlockSpec((1, c_out_pad), lambda b: (0, 0)),
                pl.BlockSpec((1, c_out_pad), lambda b: (0, 0)),
            ],
            out_specs=pl.BlockSpec((None, t_out, c_out_pad), lambda b: (b, 0, 0)),
        ),
        compiler_params=pltpu.CompilerParams(
            dimension_semantics=("parallel",),      # megacore-shard the batch axis on v7x
            vmem_limit_bytes=32 * 1024 * 1024,      # v5e default scoped VMEM is only 16 MiB
        ),
    )(x_pad, wa, wg, ba, bg)


# ---------------------------------------------------------------------------
# JAX glue: weight re-layout / padding and time padding (no im2col, no patch blowup)
# ---------------------------------------------------------------------------
def _prep_weights(w, b, c_in_eff, compute_dtype):
    """Conv1d weight (2*C_out, C_in, k), bias (2*C_out,) ->
    (W_a, W_g) of shape (k, c_in_eff, C_out_pad) and (b_a, b_g) of shape (1, C_out_pad)."""
    c_out2, c_in, k = w.shape
    c_out = c_out2 // 2
    c_out_pad = _round_up(c_out, 128)               # lane-dense output channels

    w_kio = jnp.transpose(w, (2, 1, 0))             # (k, c_in, 2*c_out)
    pad_spec = ((0, 0), (0, c_in_eff - c_in), (0, c_out_pad - c_out))
    wa = jnp.pad(w_kio[:, :, :c_out], pad_spec).astype(compute_dtype)
    wg = jnp.pad(w_kio[:, :, c_out:], pad_spec).astype(compute_dtype)

    ba = jnp.pad(b[:c_out], (0, c_out_pad - c_out)).reshape(1, c_out_pad).astype(jnp.float32)
    bg = jnp.pad(b[c_out:], (0, c_out_pad - c_out)).reshape(1, c_out_pad).astype(jnp.float32)
    return wa, wg, ba, bg


def _pad_time(x_btc, k):
    """Zero-pad the time axis for stride-2 / padding=k//2 conv (+ round up to 8 rows)."""
    B, T, C = x_btc.shape
    pad = k // 2
    t_out = (T + 2 * pad - k) // 2 + 1
    t_need = max(T + 2 * pad, 2 * (t_out - 1) + k)
    t_pad = _round_up(t_need, 8)
    x_p = jnp.pad(x_btc, ((0, 0), (pad, t_pad - T - pad), (0, 0)))
    return x_p, t_out


# ---------------------------------------------------------------------------
# Conv1dSubsampler forward
# ---------------------------------------------------------------------------
@functools.partial(jax.jit, static_argnames=("kernel_sizes", "out_channels", "compute_dtype"))
def conv1d_subsampler_forward(x, weights, biases, *, kernel_sizes, out_channels,
                              compute_dtype=jnp.float32):
    """x: (B, T_in, C_in) float32 -> (B, T_out, out_channels) float32."""
    h = x.astype(jnp.float32)
    for w, b, k in zip(weights, biases, kernel_sizes):
        wa, wg, ba, bg = _prep_weights(w, b, h.shape[-1], compute_dtype)
        x_pad, t_out = _pad_time(h, k)
        h = _conv_glu_layer(x_pad, wa, wg, ba, bg, t_out)   # (B, t_out, c_out_pad)
    return h[:, :, :out_channels]                           # drop lane padding at the end


def init_params(key, in_channels, mid_channels, out_channels, kernel_sizes=(3, 3)):
    """Deterministic synthetic weights mirroring the nn.Conv1d shapes."""
    n_layers = len(kernel_sizes)
    weights, biases = [], []
    for i, k in enumerate(kernel_sizes):
        c_in = in_channels if i == 0 else mid_channels // 2
        c_out2 = mid_channels if i < n_layers - 1 else out_channels * 2
        key, kw, kb = jax.random.split(key, 3)
        bound = 1.0 / jnp.sqrt(c_in * k)
        w = jax.random.uniform(kw, (c_out2, c_in, k), jnp.float32, -bound, bound)
        b = jax.random.uniform(kb, (c_out2,), jnp.float32, -bound, bound)
        weights.append(w)
        biases.append(b)
    return tuple(weights), tuple(biases)


# ---------------------------------------------------------------------------
# Pure-JAX reference (for correctness check)
# ---------------------------------------------------------------------------
def _reference_forward(x, weights, biases, kernel_sizes):
    h = jnp.transpose(x, (0, 2, 1))                          # (B, C, T) like PyTorch NCL
    for w, b, k in zip(weights, biases, kernel_sizes):
        y = jax.lax.conv_general_dilated(
            h, w,
            window_strides=(2,),
            padding=[(k // 2, k // 2)],
            dimension_numbers=("NCH", "OIH", "NCH"),
        ) + b[None, :, None]
        c = y.shape[1] // 2
        h = y[:, :c, :] * jax.nn.sigmoid(y[:, c:, :])        # GLU over channel dim
    return jnp.transpose(h, (0, 2, 1))                       # (B, T_out, C_out)


if __name__ == "__main__":
    key = jax.random.PRNGKey(0)
    k_x, k_p = jax.random.split(key)

    # Small, module-consistent shapes.
    B, T_in, in_channels = 2, 16, 8
    mid_channels, out_channels = 16, 12
    kernel_sizes = (3, 3)

    x = jax.random.normal(k_x, (B, T_in, in_channels), jnp.float32)
    weights, biases = init_params(k_p, in_channels, mid_channels, out_channels, kernel_sizes)

    ref = jax.block_until_ready(_reference_forward(x, weights, biases, kernel_sizes))

    # f32 compute path: must match the reference tightly.
    out = conv1d_subsampler_forward(
        x, weights, biases, kernel_sizes=kernel_sizes, out_channels=out_channels,
        compute_dtype=jnp.float32)
    out = jax.block_until_ready(out)
    assert out.shape == ref.shape, (out.shape, ref.shape)
    assert jnp.allclose(out, ref, atol=1e-4, rtol=1e-4), "f32 mismatch vs reference"

    # bf16-on-MXU path (f32 accumulation): looser tolerance, same semantics.
    out_bf16 = conv1d_subsampler_forward(
        x, weights, biases, kernel_sizes=kernel_sizes, out_channels=out_channels,
        compute_dtype=jnp.bfloat16)
    out_bf16 = jax.block_until_ready(out_bf16)
    assert out_bf16.shape == ref.shape
    assert jnp.allclose(out_bf16, ref, atol=5e-2, rtol=5e-2), "bf16 mismatch vs reference"

    print("KERNEL_OK")
</pallas_src>

<mosaic_0001>
module attributes {stable_mosaic.version = 11 : i64} {
  func.func @_conv_glu_kernel(%arg0: i32, %arg1: memref<1x16x128xf32, #tpu.memory_space<vmem>>, %arg2: memref<3x128x128xf32, #tpu.memory_space<vmem>>, %arg3: memref<3x128x128xf32, #tpu.memory_space<vmem>>, %arg4: memref<1x128xf32, #tpu.memory_space<vmem>>, %arg5: memref<1x128xf32, #tpu.memory_space<vmem>>, %arg6: memref<1x4x128xf32, #tpu.memory_space<vmem>>) attributes {dimension_semantics = [#tpu.dimension_semantics<parallel>], iteration_bounds = array<i64: 2>, scalar_prefetch = 0 : i64, scratch_operands = 0 : i64, tpu.core_type = #tpu.core_type<tc>, window_params = [{transform_indices = @transform_0, window_bounds = array<i64: 1, 16, 128>}, {pipeline_mode = #tpu.pipeline_mode<synchronous>, transform_indices = @transform_1, window_bounds = array<i64: 3, 128, 128>}, {pipeline_mode = #tpu.pipeline_mode<synchronous>, transform_indices = @transform_2, window_bounds = array<i64: 3, 128, 128>}, {pipeline_mode = #tpu.pipeline_mode<synchronous>, transform_indices = @transform_3, window_bounds = array<i64: 1, 128>}, {pipeline_mode = #tpu.pipeline_mode<synchronous>, transform_indices = @transform_4, window_bounds = array<i64: 1, 128>}, {transform_indices = @transform_5, window_bounds = array<i64: 1, 4, 128>}]} {
    %cst = arith.constant 0.000000e+00 : f32
    %0 = vector.broadcast %cst : f32 to vector<4x128xf32>
    %cst_0 = arith.constant 0.000000e+00 : f32
    %1 = vector.broadcast %cst_0 : f32 to vector<4x128xf32>
    %c0 = arith.constant 0 : index
    %c0_1 = arith.constant 0 : index
    %c0_2 = arith.constant 0 : index
    %2 = tpu.strided_load %arg1[%c0, %c0_1, %c0_2] {strides = array<i32: 1, 2, 1>} : memref<1x16x128xf32, #tpu.memory_space<vmem>>, vector<1x4x128xf32>
    %3 = vector.shape_cast %2 : vector<1x4x128xf32> to vector<4x128xf32>
    %c0_3 = arith.constant 0 : index
    %c0_4 = arith.constant 0 : index
    %c0_5 = arith.constant 0 : index
    %4 = vector.load %arg2[%c0_3, %c0_4, %c0_5] : memref<3x128x128xf32, #tpu.memory_space<vmem>>, vector<1x128x128xf32>
    %5 = vector.shape_cast %4 : vector<1x128x128xf32> to vector<128x128xf32>
    %cst_6 = arith.constant dense<0.000000e+00> : vector<4x128xf32>
    %6 = tpu.matmul %3, %5, %cst_6 {dimension_numbers = #tpu.dot_dimension_numbers<[1], [0], [0], [1], [0, 0, 1, 1], [], []>} : vector<4x128xf32>, vector<128x128xf32>, vector<4x128xf32> -> vector<4x128xf32>
    %7 = arith.addf %0, %6 : vector<4x128xf32>
    %c0_7 = arith.constant 0 : index
    %c0_8 = arith.constant 0 : index
    %c0_9 = arith.constant 0 : index
    %8 = vector.load %arg3[%c0_7, %c0_8, %c0_9] : memref<3x128x128xf32, #tpu.memory_space<vmem>>, vector<1x128x128xf32>
    %9 = vector.shape_cast %8 : vector<1x128x128xf32> to vector<128x128xf32>
    %cst_10 = arith.constant dense<0.000000e+00> : vector<4x128xf32>
    %10 = tpu.matmul %3, %9, %cst_10 {dimension_numbers = #tpu.dot_dimension_numbers<[1], [0], [0], [1], [0, 0, 1, 1], [], []>} : vector<4x128xf32>, vector<128x128xf32>, vector<4x128xf32> -> vector<4x128xf32>
    %11 = arith.addf %1, %10 : vector<4x128xf32>
    %c0_11 = arith.constant 0 : index
    %c1 = arith.constant 1 : index
    %c0_12 = arith.constant 0 : index
    %12 = tpu.strided_load %arg1[%c0_11, %c1, %c0_12] {strides = array<i32: 1, 2, 1>} : memref<1x16x128xf32, #tpu.memory_space<vmem>>, vector<1x4x128xf32>
    %13 = vector.shape_cast %12 : vector<1x4x128xf32> to vector<4x128xf32>
    %c1_13 = arith.constant 1 : index
    %c0_14 = arith.constant 0 : index
    %c0_15 = arith.constant 0 : index
    %14 = vector.load %arg2[%c1_13, %c0_14, %c0_15] : memref<3x128x128xf32, #tpu.memory_space<vmem>>, vector<1x128x128xf32>
    %15 = vector.shape_cast %14 : vector<1x128x128xf32> to vector<128x128xf32>
    %cst_16 = arith.constant dense<0.000000e+00> : vector<4x128xf32>
    %16 = tpu.matmul %13, %15, %cst_16 {dimension_numbers = #tpu.dot_dimension_numbers<[1], [0], [0], [1], [0, 0, 1, 1], [], []>} : vector<4x128xf32>, vector<128x128xf32>, vector<4x128xf32> -> vector<4x128xf32>
    %17 = arith.addf %7, %16 : vector<4x128xf32>
    %c1_17 = arith.constant 1 : index
    %c0_18 = arith.constant 0 : index
    %c0_19 = arith.constant 0 : index
    %18 = vector.load %arg3[%c1_17, %c0_18, %c0_19] : memref<3x128x128xf32, #tpu.memory_space<vmem>>, vector<1x128x128xf32>
    %19 = vector.shape_cast %18 : vector<1x128x128xf32> to vector<128x128xf32>
    %cst_20 = arith.constant dense<0.000000e+00> : vector<4x128xf32>
    %20 = tpu.matmul %13, %19, %cst_20 {dimension_numbers = #tpu.dot_dimension_numbers<[1], [0], [0], [1], [0, 0, 1, 1], [], []>} : vector<4x128xf32>, vector<128x128xf32>, vector<4x128xf32> -> vector<4x128xf32>
    %21 = arith.addf %11, %20 : vector<4x128xf32>
    %c0_21 = arith.constant 0 : index
    %c2 = arith.constant 2 : index
    %c0_22 = arith.constant 0 : index
    %22 = tpu.strided_load %arg1[%c0_21, %c2, %c0_22] {strides = array<i32: 1, 2, 1>} : memref<1x16x128xf32, #tpu.memory_space<vmem>>, vector<1x4x128xf32>
    %23 = vector.shape_cast %22 : vector<1x4x128xf32> to vector<4x128xf32>
    %c2_23 = arith.constant 2 : index
    %c0_24 = arith.constant 0 : index
    %c0_25 = arith.constant 0 : index
    %24 = vector.load %arg2[%c2_23, %c0_24, %c0_25] : memref<3x128x128xf32, #tpu.memory_space<vmem>>, vector<1x128x128xf32>
    %25 = vector.shape_cast %24 : vector<1x128x128xf32> to vector<128x128xf32>
    %cst_26 = arith.constant dense<0.000000e+00> : vector<4x128xf32>
    %26 = tpu.matmul %23, %25, %cst_26 {dimension_numbers = #tpu.dot_dimension_numbers<[1], [0], [0], [1], [0, 0, 1, 1], [], []>} : vector<4x128xf32>, vector<128x128xf32>, vector<4x128xf32> -> vector<4x128xf32>
    %27 = arith.addf %17, %26 : vector<4x128xf32>
    %c2_27 = arith.constant 2 : index
    %c0_28 = arith.constant 0 : index
    %c0_29 = arith.constant 0 : index
    %28 = vector.load %arg3[%c2_27, %c0_28, %c0_29] : memref<3x128x128xf32, #tpu.memory_space<vmem>>, vector<1x128x128xf32>
    %29 = vector.shape_cast %28 : vector<1x128x128xf32> to vector<128x128xf32>
    %cst_30 = arith.constant dense<0.000000e+00> : vector<4x128xf32>
    %30 = tpu.matmul %23, %29, %cst_30 {dimension_numbers = #tpu.dot_dimension_numbers<[1], [0], [0], [1], [0, 0, 1, 1], [], []>} : vector<4x128xf32>, vector<128x128xf32>, vector<4x128xf32> -> vector<4x128xf32>
    %31 = arith.addf %21, %30 : vector<4x128xf32>
    %c0_31 = arith.constant 0 : index
    %c0_32 = arith.constant 0 : index
    %32 = vector.load %arg4[%c0_31, %c0_32] : memref<1x128xf32, #tpu.memory_space<vmem>>, vector<1x128xf32>
    %33 = vector.broadcast %32 : vector<1x128xf32> to vector<4x128xf32>
    %34 = arith.addf %27, %33 : vector<4x128xf32>
    %c0_33 = arith.constant 0 : index
    %c0_34 = arith.constant 0 : index
    %35 = vector.load %arg5[%c0_33, %c0_34] : memref<1x128xf32, #tpu.memory_space<vmem>>, vector<1x128xf32>
    %36 = vector.broadcast %35 : vector<1x128xf32> to vector<4x128xf32>
    %37 = arith.addf %31, %36 : vector<4x128xf32>
    %38 = arith.negf %37 : vector<4x128xf32>
    %39 = math.exp %38 : vector<4x128xf32>
    %cst_35 = arith.constant 1.000000e+00 : f32
    %40 = vector.broadcast %cst_35 : f32 to vector<4x128xf32>
    %41 = arith.addf %40, %39 : vector<4x128xf32>
    %42 = arith.divf %40, %41 : vector<4x128xf32>
    %43 = arith.mulf %34, %42 : vector<4x128xf32>
    %c0_36 = arith.constant 0 : index
    %c0_37 = arith.constant 0 : index
    %c0_38 = arith.constant 0 : index
    %44 = vector.load %arg6[%c0_36, %c0_37, %c0_38] : memref<1x4x128xf32, #tpu.memory_space<vmem>>, vector<1x4x128xf32>
    %45 = vector.shape_cast %44 : vector<1x4x128xf32> to vector<4x128xf32>
    %46 = vector.shape_cast %43 : vector<4x128xf32> to vector<1x4x128xf32>
    tpu.vector_store %arg6[%c0_36, %c0_37, %c0_38], %46 {strides = array<i32>} : memref<1x4x128xf32, #tpu.memory_space<vmem>>, vector<1x4x128xf32>,
    return
  }
  func.func @transform_0(%arg0: i32) -> (i32, i32, i32) {
    %c0_i32 = arith.constant 0 : i32
    %c0_i32_0 = arith.constant 0 : i32
    %c0_i32_1 = arith.constant 0 : i32
    return %arg0, %c0_i32, %c0_i32_0 : i32, i32, i32
  }
  func.func @transform_1(%arg0: i32) -> (i32, i32, i32) {
    %c0_i32 = arith.constant 0 : i32
    %c0_i32_0 = arith.constant 0 : i32
    %c0_i32_1 = arith.constant 0 : i32
    %c0_i32_2 = arith.constant 0 : i32
    return %c0_i32, %c0_i32_0, %c0_i32_1 : i32, i32, i32
  }
  func.func @transform_2(%arg0: i32) -> (i32, i32, i32) {
    %c0_i32 = arith.constant 0 : i32
    %c0_i32_0 = arith.constant 0 : i32
    %c0_i32_1 = arith.constant 0 : i32
    %c0_i32_2 = arith.constant 0 : i32
    return %c0_i32, %c0_i32_0, %c0_i32_1 : i32, i32, i32
  }
  func.func @transform_3(%arg0: i32) -> (i32, i32) {
    %c0_i32 = arith.constant 0 : i32
    %c0_i32_0 = arith.constant 0 : i32
    %c0_i32_1 = arith.constant 0 : i32
    return %c0_i32, %c0_i32_0 : i32, i32
  }
  func.func @transform_4(%arg0: i32) -> (i32, i32) {
    %c0_i32 = arith.constant 0 : i32
    %c0_i32_0 = arith.constant 0 : i32
    %c0_i32_1 = arith.constant 0 : i32
    return %c0_i32, %c0_i32_0 : i32, i32
  }
  func.func @transform_5(%arg0: i32) -> (i32, i32, i32) {
    %c0_i32 = arith.constant 0 : i32
    %c0_i32_0 = arith.constant 0 : i32
    %c0_i32_1 = arith.constant 0 : i32
    return %arg0, %c0_i32, %c0_i32_0 : i32, i32, i32
  }
}

module attributes {stable_mosaic.version = 11 : i64} {
  func.func @_conv_glu_kernel(%arg0: i32, %arg1: memref<1x24x8xf32, #tpu.memory_space<vmem>>, %arg2: memref<3x8x128xf32, #tpu.memory_space<vmem>>, %arg3: memref<3x8x128xf32, #tpu.memory_space<vmem>>, %arg4: memref<1x128xf32, #tpu.memory_space<vmem>>, %arg5: memref<1x128xf32, #tpu.memory_space<vmem>>, %arg6: memref<1x8x128xf32, #tpu.memory_space<vmem>>) attributes {dimension_semantics = [#tpu.dimension_semantics<parallel>], iteration_bounds = array<i64: 2>, scalar_prefetch = 0 : i64, scratch_operands = 0 : i64, tpu.core_type = #tpu.core_type<tc>, window_params = [{transform_indices = @transform_0, window_bounds = array<i64: 1, 24, 8>}, {pipeline_mode = #tpu.pipeline_mode<synchronous>, transform_indices = @transform_1, window_bounds = array<i64: 3, 8, 128>}, {pipeline_mode = #tpu.pipeline_mode<synchronous>, transform_indices = @transform_2, window_bounds = array<i64: 3, 8, 128>}, {pipeline_mode = #tpu.pipeline_mode<synchronous>, transform_indices = @transform_3, window_bounds = array<i64: 1, 128>}, {pipeline_mode = #tpu.pipeline_mode<synchronous>, transform_indices = @transform_4, window_bounds = array<i64: 1, 128>}, {transform_indices = @transform_5, window_bounds = array<i64: 1, 8, 128>}]} {
    %cst = arith.constant 0.000000e+00 : f32
    %0 = vector.broadcast %cst : f32 to vector<8x128xf32>
    %cst_0 = arith.constant 0.000000e+00 : f32
    %1 = vector.broadcast %cst_0 : f32 to vector<8x128xf32>
    %c0 = arith.constant 0 : index
    %c0_1 = arith.constant 0 : index
    %c0_2 = arith.constant 0 : index
    %2 = tpu.strided_load %arg1[%c0, %c0_1, %c0_2] {strides = array<i32: 1, 2, 1>} : memref<1x24x8xf32, #tpu.memory_space<vmem>>, vector<1x8x8xf32>
    %3 = vector.shape_cast %2 : vector<1x8x8xf32> to vector<8x8xf32>
    %c0_3 = arith.constant 0 : index
    %c0_4 = arith.constant 0 : index
    %c0_5 = arith.constant 0 : index
    %4 = vector.load %arg2[%c0_3, %c0_4, %c0_5] : memref<3x8x128xf32, #tpu.memory_space<vmem>>, vector<1x8x128xf32>
    %5 = vector.shape_cast %4 : vector<1x8x128xf32> to vector<8x128xf32>
    %cst_6 = arith.constant dense<0.000000e+00> : vector<8x128xf32>
    %6 = tpu.matmul %3, %5, %cst_6 {dimension_numbers = #tpu.dot_dimension_numbers<[1], [0], [0], [1], [0, 0, 1, 1], [], []>} : vector<8x8xf32>, vector<8x128xf32>, vector<8x128xf32> -> vector<8x128xf32>
    %7 = arith.addf %0, %6 : vector<8x128xf32>
    %c0_7 = arith.constant 0 : index
    %c0_8 = arith.constant 0 : index
    %c0_9 = arith.constant 0 : index
    %8 = vector.load %arg3[%c0_7, %c0_8, %c0_9] : memref<3x8x128xf32, #tpu.memory_space<vmem>>, vector<1x8x128xf32>
    %9 = vector.shape_cast %8 : vector<1x8x128xf32> to vector<8x128xf32>
    %cst_10 = arith.constant dense<0.000000e+00> : vector<8x128xf32>
    %10 = tpu.matmul %3, %9, %cst_10 {dimension_numbers = #tpu.dot_dimension_numbers<[1], [0], [0], [1], [0, 0, 1, 1], [], []>} : vector<8x8xf32>, vector<8x128xf32>, vector<8x128xf32> -> vector<8x128xf32>
    %11 = arith.addf %1, %10 : vector<8x128xf32>
    %c0_11 = arith.constant 0 : index
    %c1 = arith.constant 1 : index
    %c0_12 = arith.constant 0 : index
    %12 = tpu.strided_load %arg1[%c0_11, %c1, %c0_12] {strides = array<i32: 1, 2, 1>} : memref<1x24x8xf32, #tpu.memory_space<vmem>>, vector<1x8x8xf32>
    %13 = vector.shape_cast %12 : vector<1x8x8xf32> to vector<8x8xf32>
    %c1_13 = arith.constant 1 : index
    %c0_14 = arith.constant 0 : index
    %c0_15 = arith.constant 0 : index
    %14 = vector.load %arg2[%c1_13, %c0_14, %c0_15] : memref<3x8x128xf32, #tpu.memory_space<vmem>>, vector<1x8x128xf32>
    %15 = vector.shape_cast %14 : vector<1x8x128xf32> to vector<8x128xf32>
    %cst_16 = arith.constant dense<0.000000e+00> : vector<8x128xf32>
    %16 = tpu.matmul %13, %15, %cst_16 {dimension_numbers = #tpu.dot_dimension_numbers<[1], [0], [0], [1], [0, 0, 1, 1], [], []>} : vector<8x8xf32>, vector<8x128xf32>, vector<8x128xf32> -> vector<8x128xf32>
    %17 = arith.addf %7, %16 : vector<8x128xf32>
    %c1_17 = arith.constant 1 : index
    %c0_18 = arith.constant 0 : index
    %c0_19 = arith.constant 0 : index
    %18 = vector.load %arg3[%c1_17, %c0_18, %c0_19] : memref<3x8x128xf32, #tpu.memory_space<vmem>>, vector<1x8x128xf32>
    %19 = vector.shape_cast %18 : vector<1x8x128xf32> to vector<8x128xf32>
    %cst_20 = arith.constant dense<0.000000e+00> : vector<8x128xf32>
    %20 = tpu.matmul %13, %19, %cst_20 {dimension_numbers = #tpu.dot_dimension_numbers<[1], [0], [0], [1], [0, 0, 1, 1], [], []>} : vector<8x8xf32>, vector<8x128xf32>, vector<8x128xf32> -> vector<8x128xf32>
    %21 = arith.addf %11, %20 : vector<8x128xf32>
    %c0_21 = arith.constant 0 : index
    %c2 = arith.constant 2 : index
    %c0_22 = arith.constant 0 : index
    %22 = tpu.strided_load %arg1[%c0_21, %c2, %c0_22] {strides = array<i32: 1, 2, 1>} : memref<1x24x8xf32, #tpu.memory_space<vmem>>, vector<1x8x8xf32>
    %23 = vector.shape_cast %22 : vector<1x8x8xf32> to vector<8x8xf32>
    %c2_23 = arith.constant 2 : index
    %c0_24 = arith.constant 0 : index
    %c0_25 = arith.constant 0 : index
    %24 = vector.load %arg2[%c2_23, %c0_24, %c0_25] : memref<3x8x128xf32, #tpu.memory_space<vmem>>, vector<1x8x128xf32>
    %25 = vector.shape_cast %24 : vector<1x8x128xf32> to vector<8x128xf32>
    %cst_26 = arith.constant dense<0.000000e+00> : vector<8x128xf32>
    %26 = tpu.matmul %23, %25, %cst_26 {dimension_numbers = #tpu.dot_dimension_numbers<[1], [0], [0], [1], [0, 0, 1, 1], [], []>} : vector<8x8xf32>, vector<8x128xf32>, vector<8x128xf32> -> vector<8x128xf32>
    %27 = arith.addf %17, %26 : vector<8x128xf32>
    %c2_27 = arith.constant 2 : index
    %c0_28 = arith.constant 0 : index
    %c0_29 = arith.constant 0 : index
    %28 = vector.load %arg3[%c2_27, %c0_28, %c0_29] : memref<3x8x128xf32, #tpu.memory_space<vmem>>, vector<1x8x128xf32>
    %29 = vector.shape_cast %28 : vector<1x8x128xf32> to vector<8x128xf32>
    %cst_30 = arith.constant dense<0.000000e+00> : vector<8x128xf32>
    %30 = tpu.matmul %23, %29, %cst_30 {dimension_numbers = #tpu.dot_dimension_numbers<[1], [0], [0], [1], [0, 0, 1, 1], [], []>} : vector<8x8xf32>, vector<8x128xf32>, vector<8x128xf32> -> vector<8x128xf32>
    %31 = arith.addf %21, %30 : vector<8x128xf32>
    %c0_31 = arith.constant 0 : index
    %c0_32 = arith.constant 0 : index
    %32 = vector.load %arg4[%c0_31, %c0_32] : memref<1x128xf32, #tpu.memory_space<vmem>>, vector<1x128xf32>
    %33 = vector.broadcast %32 : vector<1x128xf32> to vector<8x128xf32>
    %34 = arith.addf %27, %33 : vector<8x128xf32>
    %c0_33 = arith.constant 0 : index
    %c0_34 = arith.constant 0 : index
    %35 = vector.load %arg5[%c0_33, %c0_34] : memref<1x128xf32, #tpu.memory_space<vmem>>, vector<1x128xf32>
    %36 = vector.broadcast %35 : vector<1x128xf32> to vector<8x128xf32>
    %37 = arith.addf %31, %36 : vector<8x128xf32>
    %38 = arith.negf %37 : vector<8x128xf32>
    %39 = math.exp %38 : vector<8x128xf32>
    %cst_35 = arith.constant 1.000000e+00 : f32
    %40 = vector.broadcast %cst_35 : f32 to vector<8x128xf32>
    %41 = arith.addf %40, %39 : vector<8x128xf32>
    %42 = arith.divf %40, %41 : vector<8x128xf32>
    %43 = arith.mulf %34, %42 : vector<8x128xf32>
    %c0_36 = arith.constant 0 : index
    %c0_37 = arith.constant 0 : index
    %c0_38 = arith.constant 0 : index
    %44 = vector.load %arg6[%c0_36, %c0_37, %c0_38] : memref<1x8x128xf32, #tpu.memory_space<vmem>>, vector<1x8x128xf32>
    %45 = vector.shape_cast %44 : vector<1x8x128xf32> to vector<8x128xf32>
    %46 = vector.shape_cast %43 : vector<8x128xf32> to vector<1x8x128xf32>
    tpu.vector_store %arg6[%c0_36, %c0_37, %c0_38], %46 {strides = array<i32>} : memref<1x8x128xf32, #tpu.memory_space<vmem>>, vector<1x8x128xf32>,
    return
  }
  func.func @transform_0(%arg0: i32) -> (i32, i32, i32) {
    %c0_i32 = arith.constant 0 : i32
    %c0_i32_0 = arith.constant 0 : i32
    %c0_i32_1 = arith.constant 0 : i32
    return %arg0, %c0_i32, %c0_i32_0 : i32, i32, i32
  }
  func.func @transform_1(%arg0: i32) -> (i32, i32, i32) {
    %c0_i32 = arith.constant 0 : i32
    %c0_i32_0 = arith.constant 0 : i32
    %c0_i32_1 = arith.constant 0 : i32
    %c0_i32_2 = arith.constant 0 : i32
    return %c0_i32, %c0_i32_0, %c0_i32_1 : i32, i32, i32
  }
  func.func @transform_2(%arg0: i32) -> (i32, i32, i32) {
    %c0_i32 = arith.constant 0 : i32
    %c0_i32_0 = arith.constant 0 : i32
    %c0_i32_1 = arith.constant 0 : i32
    %c0_i32_2 = arith.constant 0 : i32
    return %c0_i32, %c0_i32_0, %c0_i32_1 : i32, i32, i32
  }
  func.func @transform_3(%arg0: i32) -> (i32, i32) {
    %c0_i32 = arith.constant 0 : i32
    %c0_i32_0 = arith.constant 0 : i32
    %c0_i32_1 = arith.constant 0 : i32
    return %c0_i32, %c0_i32_0 : i32, i32
  }
  func.func @transform_4(%arg0: i32) -> (i32, i32) {
    %c0_i32 = arith.constant 0 : i32
    %c0_i32_0 = arith.constant 0 : i32
    %c0_i32_1 = arith.constant 0 : i32
    return %c0_i32, %c0_i32_0 : i32, i32
  }
  func.func @transform_5(%arg0: i32) -> (i32, i32, i32) {
    %c0_i32 = arith.constant 0 : i32
    %c0_i32_0 = arith.constant 0 : i32
    %c0_i32_1 = arith.constant 0 : i32
    return %arg0, %c0_i32, %c0_i32_0 : i32, i32, i32
  }
}

</mosaic_0001>

<bundles_post_ra>
// kernel: conv1d_subsampler_forward.2
= control target key start
LH: loop header
LB: loop body
LE: loop exit
PB: predicated region body
PF: predicated region fallthrough
CT: control target
= control target key end

     0   :  { %s868_s18 = smov 0   ;;  %s925_s0 = inlined_call_operand.vmem [shape: f32[2,24,8], index: 0, kind: input, shape index: {}]   ;;  %s926_s1 = inlined_call_operand.vmem [shape: f32[3,8,128], index: 1, kind: input, shape index: {}]   ;;  %s927_s2 = inlined_call_operand.vmem [shape: f32[3,8,128], index: 2, kind: input, shape index: {}]   ;;  %s928_s3 = inlined_call_operand.vmem [shape: f32[1,128], index: 3, kind: input, shape index: {}]   ;;  %s929_s4 = inlined_call_operand.vmem [shape: f32[1,128], index: 4, kind: input, shape index: {}]   ;;  %s930_s5 = inlined_call_operand.vmem [shape: f32[2,8,128], index: 5, kind: output, shape index: {}]  }
   0x1 LB: > { %s747_s19 = sadd.s32 4294967295, %s834_s18   ;;  %p751_p0 = scmp.ge.s32.totalorder %s834_s18, 1  ;;  %s834_s18 = sphi %s868_s18, %s15_s18  }
   0x2   : > { %p187_p1 = scmp.lt.s32.totalorder %s834_s18, 3 }
   0x4   : > { %p188_p2 = pnand %p751_p0, %p187_p1 }
   0x5   : > { %p214_p3 = scmp.lt.s32.totalorder (!%p188_p2), %s747_s19, 1 }
   0x6   : > { %191 = sbr.rel (%p188_p2) target bundleno = 256 (0x100), region = 40 }
   0xb   : > { %v224_v0 = vld [vmem:[%s926_s1] sm:$0xff]  ;;  %v755_v1 = vld [vmem:[%s926_s1 + $0x8] sm:$0xff]  ;;  %v836_v2 = vmov 0.0   ;;  %s932_s19 = smov (!%p214_p3, %s747_s19), 1  ;;  %vm837_vm0 = vmmov 0   ;;  %vm230_vm1 = vcmask 64512  }
   0xc   : > { %788 = vmatprep.subr.mxu1 %v836_v2  ;;  %783 = vmatprep.subr.mxu0 %v836_v2  ;;  %s813_s24 = smul.u32 24, %s932_s19  ;;  %v225_v3 = vld [vmem:[%s927_s2] sm:$0xff]  ;;  %v758_v4 = vld [vmem:[%s927_s2 + $0x8] sm:$0xff]  ;;  %v764_v7 = vld [vmem:[%s927_s2 + $0x10] sm:$0xff]  ;;  %s753_s15 = sshll.u32 %s932_s19, 3 }
   0xd   : > { %789 = vmatpush3.msra.mxu1 %v224_v0  ;;  %784 = vmatpush3.msra.mxu0 %v755_v1  ;;  %v762_v8 = vld [vmem:[%s926_s1 + $0x10] sm:$0xff]  ;;  %v767_v21 = vld [vmem:[%s929_s4] ss:$0 sm:$0xff]  ;;  %s222_s20 = scalar_lea.vmem %s930_s5, %s753_s15 }
   0xe   : > { %785 = vmatprep.mubr.msk.f32.mxu0 %vm837_vm0, %v836_v2  ;;  %790 = vmatprep.mubr.msk.f32.mxu1 %vm837_vm0, %v836_v2  ;;  %s218_s27 = scalar_lea.vmem %s925_s0, %s813_s24  ;;  %v766_v31 = vld [vmem:[%s928_s3] ss:$0 sm:$0xff] }
   0xf   : > { %798 = vmatprep.subr.mxu1 %v836_v2  ;;  %793 = vmatprep.subr.mxu0 %v836_v2  ;;  %v754_v5 = vld [vmem:[%s218_s27 + $0x1] ss:$2 sm:$0xff]  ;;  %v223_v6 = vld [vmem:[%s218_s27] ss:$2 sm:$0xff] }
  0x10   : > { %786 = vmatmul.mubr.msk.f32.vlgmr.msra.gmra.mxu0 %vm230_vm1, %v754_v5  ;;  %791 = vmatmul.mubr.msk.f32.vlgmr.msra.gmra.mxu1 %vm230_vm1, %v223_v6  ;;  %v761_v9 = vld [vmem:[%s218_s27 + $0x2] ss:$2 sm:$0xff] }
  0x11   : > { %799 = vmatpush3.msra.mxu1 %v225_v3  ;;  %794 = vmatpush3.msra.mxu0 %v758_v4 }
  0x12   : > { %795 = vmatprep.mubr.msk.f32.mxu0 %vm837_vm0, %v836_v2  ;;  %800 = vmatprep.mubr.msk.f32.mxu1 %vm837_vm0, %v836_v2 }
  0x13   : > { %808 = vmatprep.subr.mxu1 %v836_v2  ;;  %803 = vmatprep.subr.mxu0 %v836_v2 }
  0x14   : > { %796 = vmatmul.mubr.msk.f32.vlgmr.msra.gmra.mxu0 %vm230_vm1, %v754_v5  ;;  %801 = vmatmul.mubr.msk.f32.vlgmr.msra.gmra.mxu1 %vm230_vm1, %v223_v6 }
  0x15   : > { %809 = vmatpush3.msra.mxu1 %v764_v7  ;;  %804 = vmatpush3.msra.mxu0 %v762_v8 }
  0x16   : > { %805 = vmatprep.mubr.msk.f32.mxu0 %vm837_vm0, %v836_v2  ;;  %810 = vmatprep.mubr.msk.f32.mxu1 %vm837_vm0, %v836_v2 }
  0x18   : > { %806 = vmatmul.mubr.msk.f32.vlgmr.msra.gmra.mxu0 %vm230_vm1, %v761_v9  ;;  %811 = vmatmul.mubr.msk.f32.vlgmr.msra.gmra.mxu1 %vm230_vm1, %v761_v9 }
  0xd0   : > { %v300_v10 = vpop.f32.mrf.mxu0  ;;  %v373_v11 = vpop.f32.mrf.mxu1 }
  0xd1   : > { %v374_v29 = vadd.f32 %v373_v11, %v300_v10 }
  0xd2   : > { %v787_v12 = vpop.f32.mrf.mxu0  ;;  %v792_v13 = vpop.f32.mrf.mxu1 }
  0xd4   : > { %v445_v14 = vpop.f32.mrf.mxu0  ;;  %v515_v15 = vpop.f32.mrf.mxu1 }
  0xd5   : > { %v516_v18 = vadd.f32 %v515_v15, %v445_v14 }
  0xd6   : > { %v797_v16 = vpop.f32.mrf.mxu0  ;;  %v802_v17 = vpop.f32.mrf.mxu1 }
  0xd8   : > { %v592_v19 = vpop.f32.mrf.mxu0  ;;  %v665_v20 = vpop.f32.mrf.mxu1 }
  0xd9   : > { %v669_v22 = vadd.f32 %v665_v20, %v516_v18  ;;  %v596_v30 = vadd.f32 %v592_v19, %v374_v29 }
  0xda   : > { %v812_v23 = vpop.f32.mrf.mxu1  ;;  %v807_v24 = vpop.f32.mrf.mxu0 }
  0xdb   : > { %v685_v25 = vadd.f32 %v767_v21, %v669_v22  ;;  %v677_v32 = vadd.f32 %v766_v31, %v596_v30 }
  0xdd   : > { %v768_v26 = vmul.f32 -1.442695, %v685_v25 }
  0xdf   : > { %824 = vpow2.f32 %v768_v26 }
  0xec   : > { %v825_v27 = vpop.eup %824 }
  0xed   : > { %v689_v28 = vadd.f32 1.0, %v825_v27 }
  0xef   : > { %826 = vrcp.f32 %v689_v28 }
  0xfc   : > { %v827_v33 = vpop.eup %826 }
  0xfd   : > { %v692_v34 = vmul.f32 %v827_v33, %v677_v32 }
  0xff   : > { %693 = vst [vmem:[%s222_s20] sm:$0xff] %v692_v34 }
 0x100 PF: > { %s15_s18 = sadd.s32 1, %s834_s18  }
 0x101   : > { %p12_p4 = scmp.ge.s32.totalorder %s15_s18, 4  }
 0x103   :  { %14 = sbr.rel (!%p12_p4) target bundleno = 1 (0x1), region = 76 }

// kernel: conv1d_subsampler_forward.3
= control target key start
LH: loop header
LB: loop body
LE: loop exit
PB: predicated region body
PF: predicated region fallthrough
CT: control target
= control target key end

     0   :  { %10 = vsyncpa [#allocation3], 0  ;;  %s1882_s0 = inlined_call_operand.vmem [shape: f32[2,16,128], index: 0, kind: input, shape index: {}]   ;;  %s1883_s1 = inlined_call_operand.vmem [shape: f32[3,128,128], index: 1, kind: input, shape index: {}]   ;;  %s1884_s2 = inlined_call_operand.vmem [shape: f32[3,128,128], index: 2, kind: input, shape index: {}]   ;;  %s1885_s3 = inlined_call_operand.vmem [shape: f32[1,128], index: 3, kind: input, shape index: {}]   ;;  %s1886_s4 = inlined_call_operand.vmem [shape: f32[1,128], index: 4, kind: input, shape index: {}]   ;;  %s1887_s5 = inlined_call_operand.hbm [shape: f32[2,4,128], index: 5, kind: output, shape index: {}]  }
   0x1   :  { %12 = vsyncpa [#allocation3 + $0x1], 0  ;;  %s1380_s18 = smov 0   ;;  %s1382_s19 = smov 0  }
   0x2   :  { %s1384_s20 = smov 0   ;;  %s1386_s21 = smov 0  }
   0x3 LB: > { %s1401_s22 = sadd.s32 4294967295, %s1345_s21   ;;  %s847_s23 = sadd.s32 4294967294, %s1345_s21   ;;  %s1345_s21 = sphi %s1386_s21, %s1893_s21   ;;  %s1341_s20 = sphi %s1384_s20, %s1892_s20   ;;  %s1337_s19 = sphi %s1382_s19, %s1891_s19   ;;  %s1333_s18 = sphi %s1380_s18, %s1890_s18  }
   0x4   : > { %s1405_s24 = sadd.s32 1, %s1345_s21   ;;  %s135_s25 = sadd.s32 1, %s1341_s20 }
   0x5   : > { %s132_s26 = ssub.s32 %s1345_s21, %s1405_s24  ;;  %p145_p0 = scmp.ne.s32.totalorder %s1341_s20, %s1337_s19 }
   0x6   : > { %p133_p1 = scmp.eq.s32.totalorder %s132_s26, 0  ;;  %p146_p2 = scmp.eq.s32.totalorder %s1401_s22, 1 }
   0x7   : > { %p151_p3 = scmp.ne.s32.totalorder %s1337_s19, %s1333_s18  ;;  %p152_p4 = scmp.eq.s32.totalorder %s847_s23, 1 }
   0x8   : > { %s1416_s27 = scalar_select %p133_p1, %s1341_s20, %s135_s25  }
   0x9   : > { %p1418_p5 = por %p146_p2, %p145_p0  ;;  %p1422_p6 = por %p152_p4, %p151_p3 }
   0xa   : > { %p850_p7 = scmp.ge.s32.totalorder %s1345_s21, 1  ;;  %p190_p8 = scmp.lt.s32.totalorder %s1345_s21, 3 }
   0xc   : > { %p191_p9 = pnand %p850_p7, %p190_p8 }
   0xd   : > { %p218_p10 = scmp.lt.s32.totalorder (!%p191_p9), %s1401_s22, 1  ;;  %s215_s25 = sand.u32 (!%p191_p9), 1, %s1337_s19  }
   0xe   : > { %194 = sbr.rel (%p191_p9) target bundleno = 365 (0x16d), region = 40  ;;  %s851_s26 = sshll.u32 (!%p191_p9), %s215_s25, 2 }
   0xf   : > { %s924_s8 = sshll.u32 (!%p191_p9), %s1401_s22, 6  ;;  %s217_s9 = scalar_lea.vmem (!%p191_p9), [#allocation2], %s851_s26 }
  0x10   : > { %s788_s10 = sshll.u32 (!%p191_p9), %s217_s9, 4  ;;  %s786_s13 = scalar_lea.hbm (!%p191_p9), %s1887_s5, %s924_s8  ;;  %s789_s10 = int_to_ptr.vmem [resolvable:$true] %s788_s10 }
  0x11   : > { %s1285_s15 = scalar_lea.vmem (!%p191_p9), %s789_s10, 64  ;;  %s1349_s16 = smov (!%p191_p9), [#allocation2]  }
  0x12   : > { %p1286_p11 = scmp.ne.s32.totalorder (!%p191_p9), %s789_s10, %s1285_s15  ;;  %s1289_s17 = sshll.u32 (!%p191_p9), %s1349_s16, 4  ;;  %s1290_s17 = int_to_ptr.vmem [resolvable:$false] %s1289_s17 }
  0x13   : > { %v870_v0 = vld [vmem:[%s1883_s1 + $0xf8] sm:$0xff]  ;;  %v1347_v2 = vmov 0.0   ;;  %v869_v3 = vld [vmem:[%s1883_s1 + $0xf0] sm:$0xff]  ;;  %v868_v5 = vld [vmem:[%s1883_s1 + $0xe8] sm:$0xff]  ;;  %s219_s30 = scalar_select %p218_p10, %s1401_s22, 1  ;;  %vm1348_vm0 = vmmov 0  }
  0x14   : > { %v239_v1 = vld [vmem:[%s1883_s1 + $0x78] sm:$0xff]  ;;  %1030 = vmatprep.subr.mxu0 %v1347_v2  ;;  %1065 = vmatprep.subr.mxu1 %v1347_v2  ;;  %v238_v4 = vld [vmem:[%s1883_s1 + $0x70] sm:$0xff]  ;;  %v237_v6 = vld [vmem:[%s1883_s1 + $0x68] sm:$0xff]  ;;  %p1287_p12 = pnand %p1286_p11, %p1418_p5  ;;  %s1291_s22 = scalar_lea.vmem %s1290_s17, 128 }
  0x15   : > { %1031 = vmatpush3.msra.mxu0 %v870_v0  ;;  %1066 = vmatpush3.msra.mxu1 %v239_v1  ;;  %v867_v7 = vld [vmem:[%s1883_s1 + $0xe0] sm:$0xff]  ;;  %v866_v9 = vld [vmem:[%s1883_s1 + $0xd8] sm:$0xff]  ;;  %v865_v11 = vld [vmem:[%s1883_s1 + $0xd0] sm:$0xff]  ;;  %s927_s14 = sshll.u32 %s219_s30, 4  ;;  %p1292_p0 = scmp.lt.s32.totalorder %s789_s10, %s1290_s17 }
  0x16   : > { %1032 = vmatprep.subr.mxu0 %v1347_v2  ;;  %1067 = vmatprep.subr.mxu1 %v1347_v2  ;;  %v236_v8 = vld [vmem:[%s1883_s1 + $0x60] sm:$0xff]  ;;  %v235_v10 = vld [vmem:[%s1883_s1 + $0x58] sm:$0xff]  ;;  %v234_v12 = vld [vmem:[%s1883_s1 + $0x50] sm:$0xff]  ;;  %s1551_s30 = scalar_lea.vmem %s1882_s0, %s927_s14  ;;  %s775_s14 = scalar_lea.sflag [#allocation3], %s215_s25 }
  0x17   : > { %1033 = vmatpush3.msra.mxu0 %v869_v3  ;;  %1068 = vmatpush3.msra.mxu1 %v238_v4  ;;  %v864_v13 = vld [vmem:[%s1883_s1 + $0xc8] sm:$0xff]  ;;  %v863_v15 = vld [vmem:[%s1883_s1 + $0xc0] sm:$0xff]  ;;  %v862_v17 = vld [vmem:[%s1883_s1 + $0xb8] sm:$0xff]  ;;  %p1288_p13 = pneg %p1287_p12  ;;  %p1293_p1 = scmp.lt.s32.totalorder %s1291_s22, %s1285_s15 }
  0x18   : > { %1034 = vmatprep.subr.mxu0 %v1347_v2  ;;  %1069 = vmatprep.subr.mxu1 %v1347_v2  ;;  %v233_v14 = vld [vmem:[%s1883_s1 + $0x48] sm:$0xff]  ;;  %v232_v16 = vld [vmem:[%s1883_s1 + $0x40] sm:$0xff]  ;;  %v231_v18 = vld [vmem:[%s1883_s1 + $0x38] sm:$0xff] }
  0x19   : > { %1035 = vmatpush3.msra.mxu0 %v868_v5  ;;  %1070 = vmatpush3.msra.mxu1 %v237_v6  ;;  %v861_v19 = vld [vmem:[%s1883_s1 + $0xb0] sm:$0xff]  ;;  %v860_v21 = vld [vmem:[%s1883_s1 + $0xa8] sm:$0xff]  ;;  %v859_v23 = vld [vmem:[%s1883_s1 + $0xa0] sm:$0xff]  ;;  %p1294_p2 = por %p1293_p1, %p1292_p0 }
  0x1a   : > { %1036 = vmatprep.subr.mxu0 %v1347_v2  ;;  %1071 = vmatprep.subr.mxu1 %v1347_v2  ;;  %v230_v20 = vld [vmem:[%s1883_s1 + $0x30] sm:$0xff]  ;;  %v229_v22 = vld [vmem:[%s1883_s1 + $0x28] sm:$0xff]  ;;  %v228_v24 = vld [vmem:[%s1883_s1 + $0x20] sm:$0xff] }
  0x1b   : > { %1037 = vmatpush3.msra.mxu0 %v867_v7  ;;  %1072 = vmatpush3.msra.mxu1 %v236_v8  ;;  %v858_v25 = vld [vmem:[%s1883_s1 + $0x98] sm:$0xff]  ;;  %v857_v27 = vld [vmem:[%s1883_s1 + $0x90] sm:$0xff]  ;;  %v856_v29 = vld [vmem:[%s1883_s1 + $0x88] sm:$0xff]  ;;  %p1295_p3 = pnand %p1294_p2, %p1288_p13 }
  0x1c   : > { %1038 = vmatprep.subr.mxu0 %v1347_v2  ;;  %1073 = vmatprep.subr.mxu1 %v1347_v2  ;;  %v227_v26 = vld [vmem:[%s1883_s1 + $0x18] sm:$0xff]  ;;  %v226_v28 = vld [vmem:[%s1883_s1 + $0x10] sm:$0xff]  ;;  %v225_v30 = vld [vmem:[%s1883_s1 + $0x8] sm:$0xff] }
  0x1d   : > { %1039 = vmatpush3.msra.mxu0 %v866_v9  ;;  %1074 = vmatpush3.msra.mxu1 %v235_v10  ;;  %v855_v31 = vld [vmem:[%s1883_s1 + $0x80] sm:$0xff]  ;;  %v886_v35 = vld [vmem:[%s1884_s2 + $0xf8] sm:$0xff]  ;;  %v885_v37 = vld [vmem:[%s1884_s2 + $0xf0] sm:$0xff] }
  0x1e   : > { %1040 = vmatprep.subr.mxu0 %v1347_v2  ;;  %1075 = vmatprep.subr.mxu1 %v1347_v2  ;;  %v224_v32 = vld [vmem:[%s1883_s1] sm:$0xff]  ;;  %v255_v36 = vld [vmem:[%s1884_s2 + $0x78] sm:$0xff]  ;;  %v254_v38 = vld [vmem:[%s1884_s2 + $0x70] sm:$0xff] }
  0x1f   : > { %1041 = vmatpush3.msra.mxu0 %v865_v11  ;;  %1076 = vmatpush3.msra.mxu1 %v234_v12  ;;  %v1564_v33 = vld [vmem:[%s1551_s30] ss:$2 sm:$0xf]  ;;  %v1567_v34 = vld [vmem:[%s1551_s30 + $0x1] ss:$2 sm:$0xf] }
  0x20   : > { %1042 = vmatprep.subr.mxu0 %v1347_v2  ;;  %1077 = vmatprep.subr.mxu1 %v1347_v2  ;;  %v884_v39 = vld [vmem:[%s1884_s2 + $0xe8] sm:$0xff]  ;;  %v883_v41 = vld [vmem:[%s1884_s2 + $0xe0] sm:$0xff]  ;;  %v882_v43 = vld [vmem:[%s1884_s2 + $0xd8] sm:$0xff] }
  0x21   : > { %1043 = vmatpush3.msra.mxu0 %v864_v13  ;;  %1078 = vmatpush3.msra.mxu1 %v233_v14  ;;  %v253_v40 = vld [vmem:[%s1884_s2 + $0x68] sm:$0xff]  ;;  %v252_v42 = vld [vmem:[%s1884_s2 + $0x60] sm:$0xff]  ;;  %v251_v44 = vld [vmem:[%s1884_s2 + $0x58] sm:$0xff] }
  0x22   : > { %1044 = vmatprep.subr.mxu0 %v1347_v2  ;;  %1079 = vmatprep.subr.mxu1 %v1347_v2  ;;  %v881_v45 = vld [vmem:[%s1884_s2 + $0xd0] sm:$0xff]  ;;  %v880_v47 = vld [vmem:[%s1884_s2 + $0xc8] sm:$0xff]  ;;  %v879_v49 = vld [vmem:[%s1884_s2 + $0xc0] sm:$0xff] }
  0x23   : > { %1045 = vmatpush3.msra.mxu0 %v863_v15  ;;  %1080 = vmatpush3.msra.mxu1 %v232_v16  ;;  %v250_v46 = vld [vmem:[%s1884_s2 + $0x50] sm:$0xff]  ;;  %v249_v48 = vld [vmem:[%s1884_s2 + $0x48] sm:$0xff]  ;;  %v248_v50 = vld [vmem:[%s1884_s2 + $0x40] sm:$0xff] }
  0x24   : > { %1046 = vmatprep.subr.mxu0 %v1347_v2  ;;  %1081 = vmatprep.subr.mxu1 %v1347_v2  ;;  %v878_v51 = vld [vmem:[%s1884_s2 + $0xb8] sm:$0xff]  ;;  %v877_v53 = vld [vmem:[%s1884_s2 + $0xb0] sm:$0xff]  ;;  %v876_v55 = vld [vmem:[%s1884_s2 + $0xa8] sm:$0xff] }
  0x25   : > { %1047 = vmatpush3.msra.mxu0 %v862_v17  ;;  %1082 = vmatpush3.msra.mxu1 %v231_v18  ;;  %v247_v52 = vld [vmem:[%s1884_s2 + $0x38] sm:$0xff]  ;;  %v246_v54 = vld [vmem:[%s1884_s2 + $0x30] sm:$0xff]  ;;  %v245_v56 = vld [vmem:[%s1884_s2 + $0x28] sm:$0xff] }
  0x26   : > { %1048 = vmatprep.subr.mxu0 %v1347_v2  ;;  %1083 = vmatprep.subr.mxu1 %v1347_v2  ;;  %v875_v57 = vld [vmem:[%s1884_s2 + $0xa0] sm:$0xff]  ;;  %v874_v59 = vld [vmem:[%s1884_s2 + $0x98] sm:$0xff]  ;;  %v873_v61 = vld [vmem:[%s1884_s2 + $0x90] sm:$0xff] }
  0x27   : > { %1049 = vmatpush3.msra.mxu0 %v861_v19  ;;  %1084 = vmatpush3.msra.mxu1 %v230_v20  ;;  %v244_v58 = vld [vmem:[%s1884_s2 + $0x20] sm:$0xff]  ;;  %v243_v60 = vld [vmem:[%s1884_s2 + $0x18] sm:$0xff]  ;;  %v242_v62 = vld [vmem:[%s1884_s2 + $0x10] sm:$0xff] }
  0x28   : > { %1050 = vmatprep.subr.mxu0 %v1347_v2  ;;  %1085 = vmatprep.subr.mxu1 %v1347_v2  ;;  %v872_v63 = vld [vmem:[%s1884_s2 + $0x88] sm:$0xff]  ;;  %v871_v1 = vld [vmem:[%s1884_s2 + $0x80] sm:$0xff]  ;;  %v903_v4 = vld [vmem:[%s1883_s1 + $0x178] sm:$0xff] }
  0x29   : > { %1051 = vmatpush3.msra.mxu0 %v860_v21  ;;  %1086 = vmatpush3.msra.mxu1 %v229_v22  ;;  %v241_v0 = vld [vmem:[%s1884_s2 + $0x8] sm:$0xff]  ;;  %v240_v3 = vld [vmem:[%s1884_s2] sm:$0xff]  ;;  %v919_v5 = vld [vmem:[%s1884_s2 + $0x178] sm:$0xff] }
  0x2a   : > { %1052 = vmatprep.subr.mxu0 %v1347_v2  ;;  %1087 = vmatprep.subr.mxu1 %v1347_v2  ;;  %v902_v6 = vld [vmem:[%s1883_s1 + $0x170] sm:$0xff]  ;;  %v901_v8 = vld [vmem:[%s1883_s1 + $0x168] sm:$0xff]  ;;  %v900_v10 = vld [vmem:[%s1883_s1 + $0x160] sm:$0xff] }
  0x2b   : > { %1053 = vmatpush3.msra.mxu0 %v859_v23  ;;  %1088 = vmatpush3.msra.mxu1 %v228_v24  ;;  %v918_v7 = vld [vmem:[%s1884_s2 + $0x170] sm:$0xff]  ;;  %v917_v9 = vld [vmem:[%s1884_s2 + $0x168] sm:$0xff]  ;;  %v916_v11 = vld [vmem:[%s1884_s2 + $0x160] sm:$0xff] }
  0x2c   : > { %1054 = vmatprep.subr.mxu0 %v1347_v2  ;;  %1089 = vmatprep.subr.mxu1 %v1347_v2  ;;  %v899_v12 = vld [vmem:[%s1883_s1 + $0x158] sm:$0xff]  ;;  %v898_v14 = vld [vmem:[%s1883_s1 + $0x150] sm:$0xff]  ;;  %v897_v16 = vld [vmem:[%s1883_s1 + $0x148] sm:$0xff] }
  0x2d   : > { %1055 = vmatpush3.msra.mxu0 %v858_v25  ;;  %1090 = vmatpush3.msra.mxu1 %v227_v26  ;;  %v915_v13 = vld [vmem:[%s1884_s2 + $0x158] sm:$0xff]  ;;  %v914_v15 = vld [vmem:[%s1884_s2 + $0x150] sm:$0xff]  ;;  %v913_v17 = vld [vmem:[%s1884_s2 + $0x148] sm:$0xff] }
  0x2e   : > { %1056 = vmatprep.subr.mxu0 %v1347_v2  ;;  %1091 = vmatprep.subr.mxu1 %v1347_v2  ;;  %v896_v18 = vld [vmem:[%s1883_s1 + $0x140] sm:$0xff]  ;;  %v895_v20 = vld [vmem:[%s1883_s1 + $0x138] sm:$0xff]  ;;  %v894_v22 = vld [vmem:[%s1883_s1 + $0x130] sm:$0xff] }
  0x2f   : > { %1057 = vmatpush3.msra.mxu0 %v857_v27  ;;  %1092 = vmatpush3.msra.mxu1 %v226_v28  ;;  %v912_v19 = vld [vmem:[%s1884_s2 + $0x140] sm:$0xff]  ;;  %v911_v21 = vld [vmem:[%s1884_s2 + $0x138] sm:$0xff]  ;;  %v910_v23 = vld [vmem:[%s1884_s2 + $0x130] sm:$0xff] }
  0x30   : > { %1058 = vmatprep.subr.mxu0 %v1347_v2  ;;  %1093 = vmatprep.subr.mxu1 %v1347_v2  ;;  %v893_v24 = vld [vmem:[%s1883_s1 + $0x128] sm:$0xff]  ;;  %v892_v26 = vld [vmem:[%s1883_s1 + $0x120] sm:$0xff]  ;;  %v891_v28 = vld [vmem:[%s1883_s1 + $0x118] sm:$0xff] }
  0x31   : > { %1059 = vmatpush3.msra.mxu0 %v856_v29  ;;  %1094 = vmatpush3.msra.mxu1 %v225_v30  ;;  %v909_v25 = vld [vmem:[%s1884_s2 + $0x128] sm:$0xff]  ;;  %v908_v27 = vld [vmem:[%s1884_s2 + $0x120] sm:$0xff]  ;;  %v907_v29 = vld [vmem:[%s1884_s2 + $0x118] sm:$0xff] }
  0x32   : > { %1060 = vmatprep.subr.mxu0 %v1347_v2  ;;  %1095 = vmatprep.subr.mxu1 %v1347_v2  ;;  %v890_v30 = vld [vmem:[%s1883_s1 + $0x110] sm:$0xff] }
  0x33   : > { %1061 = vmatpush3.msra.mxu0 %v855_v31  ;;  %1096 = vmatpush3.msra.mxu1 %v224_v32  ;;  %v906_v31 = vld [vmem:[%s1884_s2 + $0x110] sm:$0xff]  ;;  %v889_v32 = vld [vmem:[%s1883_s1 + $0x108] sm:$0xff] }
  0x34   : > { %1097 = vmatprep.mubr.msk.f32.mxu1 %vm1348_vm0, %v1347_v2  ;;  %1062 = vmatprep.mubr.msk.f32.mxu0 %vm1348_vm0, %v1347_v2 }
  0x35   : > { %1098 = vmatmul.mubr.f32.vlgmr.msra.gmra.mxu1 %v1564_v33  ;;  %1100 = vmatprep.subr.mxu0 %v1347_v2 }
  0x36   : > { %1135 = vmatprep.subr.mxu1 %v1347_v2  ;;  %1063 = vmatmul.mubr.f32.vlgmr.msra.gmra.mxu0 %v1567_v34 }
  0x37   : > { %1101 = vmatpush3.msra.mxu0 %v886_v35  ;;  %1136 = vmatpush3.msra.mxu1 %v255_v36  ;;  %v904_v35 = vld [vmem:[%s1884_s2 + $0x100] sm:$0xff] }
  0x38   : > { %1102 = vmatprep.subr.mxu0 %v1347_v2  ;;  %1137 = vmatprep.subr.mxu1 %v1347_v2  ;;  %v887_v36 = vld [vmem:[%s1551_s30 + $0x2] ss:$2 sm:$0xf] }
  0x39   : > { %1103 = vmatpush3.msra.mxu0 %v885_v37  ;;  %1138 = vmatpush3.msra.mxu1 %v254_v38 }
  0x3a   : > { %1104 = vmatprep.subr.mxu0 %v1347_v2  ;;  %1139 = vmatprep.subr.mxu1 %v1347_v2 }
  0x3b   : > { %1105 = vmatpush3.msra.mxu0 %v884_v39  ;;  %1140 = vmatpush3.msra.mxu1 %v253_v40 }
  0x3c   : > { %1106 = vmatprep.subr.mxu0 %v1347_v2  ;;  %1141 = vmatprep.subr.mxu1 %v1347_v2 }
  0x3d   : > { %1107 = vmatpush3.msra.mxu0 %v883_v41  ;;  %1142 = vmatpush3.msra.mxu1 %v252_v42 }
  0x3e   : > { %1108 = vmatprep.subr.mxu0 %v1347_v2  ;;  %1143 = vmatprep.subr.mxu1 %v1347_v2 }
  0x3f   : > { %1109 = vmatpush3.msra.mxu0 %v882_v43  ;;  %1144 = vmatpush3.msra.mxu1 %v251_v44 }
  0x40   : > { %1110 = vmatprep.subr.mxu0 %v1347_v2  ;;  %1145 = vmatprep.subr.mxu1 %v1347_v2 }
  0x41   : > { %1111 = vmatpush3.msra.mxu0 %v881_v45  ;;  %1146 = vmatpush3.msra.mxu1 %v250_v46 }
  0x42   : > { %1112 = vmatprep.subr.mxu0 %v1347_v2  ;;  %1147 = vmatprep.subr.mxu1 %v1347_v2 }
  0x43   : > { %1113 = vmatpush3.msra.mxu0 %v880_v47  ;;  %1148 = vmatpush3.msra.mxu1 %v249_v48 }
  0x44   : > { %1114 = vmatprep.subr.mxu0 %v1347_v2  ;;  %1149 = vmatprep.subr.mxu1 %v1347_v2 }
  0x45   : > { %1115 = vmatpush3.msra.mxu0 %v879_v49  ;;  %1150 = vmatpush3.msra.mxu1 %v248_v50 }
  0x46   : > { %1116 = vmatprep.subr.mxu0 %v1347_v2  ;;  %1151 = vmatprep.subr.mxu1 %v1347_v2 }
  0x47   : > { %1117 = vmatpush3.msra.mxu0 %v878_v51  ;;  %1152 = vmatpush3.msra.mxu1 %v247_v52 }
  0x48   : > { %1118 = vmatprep.subr.mxu0 %v1347_v2  ;;  %1153 = vmatprep.subr.mxu1 %v1347_v2 }
  0x49   : > { %1119 = vmatpush3.msra.mxu0 %v877_v53  ;;  %1154 = vmatpush3.msra.mxu1 %v246_v54 }
  0x4a   : > { %1120 = vmatprep.subr.mxu0 %v1347_v2  ;;  %1155 = vmatprep.subr.mxu1 %v1347_v2 }
  0x4b   : > { %1121 = vmatpush3.msra.mxu0 %v876_v55  ;;  %1156 = vmatpush3.msra.mxu1 %v245_v56 }
  0x4c   : > { %1122 = vmatprep.subr.mxu0 %v1347_v2  ;;  %1157 = vmatprep.subr.mxu1 %v1347_v2 }
  0x4d   : > { %1123 = vmatpush3.msra.mxu0 %v875_v57  ;;  %1158 = vmatpush3.msra.mxu1 %v244_v58  ;;  %v920_v57 = vld [vmem:[%s1885_s3] ss:$0 sm:$0xff] }
  0x4e   : > { %1124 = vmatprep.subr.mxu0 %v1347_v2  ;;  %1159 = vmatprep.subr.mxu1 %v1347_v2 }
  0x4f   : > { %1125 = vmatpush3.msra.mxu0 %v874_v59  ;;  %1160 = vmatpush3.msra.mxu1 %v243_v60 }
  0x50   : > { %1126 = vmatprep.subr.mxu0 %v1347_v2  ;;  %1161 = vmatprep.subr.mxu1 %v1347_v2 }
  0x51   : > { %1127 = vmatpush3.msra.mxu0 %v873_v61  ;;  %1162 = vmatpush3.msra.mxu1 %v242_v62 }
  0x52   : > { %1128 = vmatprep.subr.mxu0 %v1347_v2  ;;  %1163 = vmatprep.subr.mxu1 %v1347_v2 }
  0x53   : > { %1129 = vmatpush3.msra.mxu0 %v872_v63  ;;  %1164 = vmatpush3.msra.mxu1 %v241_v0 }
  0x54   : > { %1130 = vmatprep.subr.mxu0 %v1347_v2  ;;  %1165 = vmatprep.subr.mxu1 %v1347_v2 }
  0x55   : > { %1131 = vmatpush3.msra.mxu0 %v871_v1  ;;  %1166 = vmatpush3.msra.mxu1 %v240_v3 }
  0x56   : > { %1167 = vmatprep.mubr.msk.f32.mxu1 %vm1348_vm0, %v1347_v2  ;;  %1132 = vmatprep.mubr.msk.f32.mxu0 %vm1348_vm0, %v1347_v2 }
  0x57   : > { %1168 = vmatmul.mubr.f32.vlgmr.msra.gmra.mxu1 %v1564_v33  ;;  %1170 = vmatprep.subr.mxu0 %v1347_v2  ;;  %v905_v33 = vld [vmem:[%s1884_s2 + $0x108] sm:$0xff] }
  0x58   : > { %1205 = vmatprep.subr.mxu1 %v1347_v2  ;;  %1133 = vmatmul.mubr.f32.vlgmr.msra.gmra.mxu0 %v1567_v34  ;;  %v888_v34 = vld [vmem:[%s1883_s1 + $0x100] sm:$0xff] }
  0x59   : > { %1171 = vmatpush3.msra.mxu0 %v903_v4  ;;  %1206 = vmatpush3.msra.mxu1 %v919_v5 }
  0x5a   : > { %1172 = vmatprep.subr.mxu0 %v1347_v2  ;;  %1207 = vmatprep.subr.mxu1 %v1347_v2 }
  0x5b   : > { %1173 = vmatpush3.msra.mxu0 %v902_v6  ;;  %1208 = vmatpush3.msra.mxu1 %v918_v7 }
  0x5c   : > { %1174 = vmatprep.subr.mxu0 %v1347_v2  ;;  %1209 = vmatprep.subr.mxu1 %v1347_v2 }
  0x5d   : > { %1175 = vmatpush3.msra.mxu0 %v901_v8  ;;  %1210 = vmatpush3.msra.mxu1 %v917_v9 }
  0x5e   : > { %1176 = vmatprep.subr.mxu0 %v1347_v2  ;;  %1211 = vmatprep.subr.mxu1 %v1347_v2 }
  0x5f   : > { %1177 = vmatpush3.msra.mxu0 %v900_v10  ;;  %1212 = vmatpush3.msra.mxu1 %v916_v11 }
  0x60   : > { %1178 = vmatprep.subr.mxu0 %v1347_v2  ;;  %1213 = vmatprep.subr.mxu1 %v1347_v2 }
  0x61   : > { %1179 = vmatpush3.msra.mxu0 %v899_v12  ;;  %1214 = vmatpush3.msra.mxu1 %v915_v13 }
  0x62   : > { %1180 = vmatprep.subr.mxu0 %v1347_v2  ;;  %1215 = vmatprep.subr.mxu1 %v1347_v2 }
  0x63   : > { %1181 = vmatpush3.msra.mxu0 %v898_v14  ;;  %1216 = vmatpush3.msra.mxu1 %v914_v15 }
  0x64   : > { %1182 = vmatprep.subr.mxu0 %v1347_v2  ;;  %1217 = vmatprep.subr.mxu1 %v1347_v2 }
  0x65   : > { %1183 = vmatpush3.msra.mxu0 %v897_v16  ;;  %1218 = vmatpush3.msra.mxu1 %v913_v17 }
  0x66   : > { %1184 = vmatprep.subr.mxu0 %v1347_v2  ;;  %1219 = vmatprep.subr.mxu1 %v1347_v2 }
  0x67   : > { %1185 = vmatpush3.msra.mxu0 %v896_v18  ;;  %1220 = vmatpush3.msra.mxu1 %v912_v19 }
  0x68   : > { %1186 = vmatprep.subr.mxu0 %v1347_v2  ;;  %1221 = vmatprep.subr.mxu1 %v1347_v2 }
  0x69   : > { %1187 = vmatpush3.msra.mxu0 %v895_v20  ;;  %1222 = vmatpush3.msra.mxu1 %v911_v21 }
  0x6a   : > { %1188 = vmatprep.subr.mxu0 %v1347_v2  ;;  %1223 = vmatprep.subr.mxu1 %v1347_v2 }
  0x6b   : > { %1189 = vmatpush3.msra.mxu0 %v894_v22  ;;  %1224 = vmatpush3.msra.mxu1 %v910_v23 }
  0x6c   : > { %1190 = vmatprep.subr.mxu0 %v1347_v2  ;;  %1225 = vmatprep.subr.mxu1 %v1347_v2 }
  0x6d   : > { %1191 = vmatpush3.msra.mxu0 %v893_v24  ;;  %1226 = vmatpush3.msra.mxu1 %v909_v25 }
  0x6e   : > { %1192 = vmatprep.subr.mxu0 %v1347_v2  ;;  %1227 = vmatprep.subr.mxu1 %v1347_v2 }
  0x6f   : > { %1193 = vmatpush3.msra.mxu0 %v892_v26  ;;  %1228 = vmatpush3.msra.mxu1 %v908_v27 }
  0x70   : > { %1194 = vmatprep.subr.mxu0 %v1347_v2  ;;  %1229 = vmatprep.subr.mxu1 %v1347_v2 }
  0x71   : > { %1195 = vmatpush3.msra.mxu0 %v891_v28  ;;  %1230 = vmatpush3.msra.mxu1 %v907_v29 }
  0x72   : > { %1196 = vmatprep.subr.mxu0 %v1347_v2  ;;  %1231 = vmatprep.subr.mxu1 %v1347_v2 }
  0x73   : > { %1197 = vmatpush3.msra.mxu0 %v890_v30  ;;  %1232 = vmatpush3.msra.mxu1 %v906_v31 }
  0x74   : > { %1198 = vmatprep.subr.mxu0 %v1347_v2  ;;  %1233 = vmatprep.subr.mxu1 %v1347_v2 }
  0x75   : > { %1199 = vmatpush3.msra.mxu0 %v889_v32  ;;  %1234 = vmatpush3.msra.mxu1 %v905_v33 }
  0x76   : > { %1200 = vmatprep.subr.mxu0 %v1347_v2  ;;  %1235 = vmatprep.subr.mxu1 %v1347_v2 }
  0x77   : > { %1201 = vmatpush3.msra.mxu0 %v888_v34  ;;  %1202 = vmatprep.mubr.msk.f32.mxu0 %vm1348_vm0, %v1347_v2 }
  0x78   : > { %1236 = vmatpush3.msra.mxu1 %v904_v35  ;;  %1237 = vmatprep.mubr.msk.f32.mxu1 %vm1348_vm0, %v1347_v2  ;;  %v921_v2 = vld [vmem:[%s1886_s4] ss:$0 sm:$0xff] }
  0x79   : > { %1203 = vmatmul.mubr.f32.vlgmr.msra.gmra.mxu0 %v887_v36  ;;  %1238 = vmatmul.mubr.f32.vlgmr.msra.gmra.mxu1 %v887_v36 }
  0xf5   : > { %v411_v37 = vpop.f32.mrf.mxu1 }
  0xf6   : > { %v341_v38 = vpop.f32.mrf.mxu0 }
  0xf7   : > { %v412_v39 = vadd.f32 %v411_v37, %v341_v38  ;;  %v1099_v40 = vpop.f32.mrf.mxu1 }
  0xf8   : > { %v1064_v41 = vpop.f32.mrf.mxu0 }
 0x117   : > { %v568_v42 = vpop.f32.mrf.mxu1 }
 0x118   : > { %v498_v43 = vpop.f32.mrf.mxu0 }
 0x119   : > { %v1169_v44 = vpop.f32.mrf.mxu1  ;;  %v569_v46 = vadd.f32 %v568_v42, %v498_v43 }
 0x11a   : > { %v1134_v45 = vpop.f32.mrf.mxu0 }
 0x139   : > { %v657_v47 = vpop.f32.mrf.mxu0  ;;  %v745_v48 = vpop.f32.mrf.mxu1 }
 0x13a   : > { %v749_v49 = vadd.f32 %v745_v48, %v569_v46  ;;  %v661_v56 = vadd.f32 %v657_v47, %v412_v39 }
 0x13b   : > { %v1239_v50 = vpop.f32.mrf.mxu1  ;;  %v1204_v51 = vpop.f32.mrf.mxu0 }
 0x13c   : > { %v765_v52 = vadd.f32 %v921_v2, %v749_v49  ;;  %v757_v58 = vadd.f32 %v920_v57, %v661_v56 }
 0x13e   : > { %v922_v53 = vmul.f32 -1.442695, %v765_v52 }
 0x140   : > { %1281 = vpow2.f32 %v922_v53 }
 0x14d   : > { %v1282_v54 = vpop.eup %1281 }
 0x14e   : > { %v769_v55 = vadd.f32 1.0, %v1282_v54 }
 0x150   : > { %1283 = vrcp.f32 %v769_v55 }
 0x15d   : > { %v1284_v59 = vpop.eup %1283 }
 0x15e   : > { %v772_v60 = vmul.f32 %v1284_v59, %v757_v58 }
 0x160   : > { %773 = vst [vmem:[%s217_s9] sm:$0xf] %v772_v60 }
 0x161   : > { %1298 = shalt.err (!%p1295_p3)
}
 0x162   : > { %s1299_s30 = scalar_lea.hbm %s786_s13, 64  ;;  %s1303_s26 = scalar_lea.hbm %s1887_s5, 128 }
 0x163   : > { %p1300_p4 = scmp.ne.s32.totalorder %s786_s13, %s1299_s30  ;;  %p1304_p9 = scmp.lt.s32.totalorder %s786_s13, %s1887_s5 }
 0x164   : > { %p1305_p10 = scmp.lt.s32.totalorder %s1303_s26, %s1299_s30 }
 0x165   : > { %p1301_p7 = pnand %p1300_p4, %p1418_p5 }
 0x166   : > { %p1306_p11 = por %p1305_p10, %p1304_p9 }
 0x167   : > { %p1302_p8 = pneg %p1301_p7 }
 0x169   : > { %p1307_p12 = pnand %p1306_p11, %p1302_p8 }
 0x16b   : > { %1310 = shalt.err (!%p1307_p12)
}
 0x16c   : > { %1240 = dma.vmem_to_hbm [thread:$0]  (%p1418_p5), %s789_s10, 64, %s786_s13, %s775_s14  }
 0x16d PF: > { %p1246_p13 = scmp.ge.s32.totalorder %s1345_s21, 2  ;;  %s800_s8 = sand.u32 1, %s1333_s18  }
 0x16e   : > { %s801_s9 = scalar_lea.sflag [#allocation3], %s800_s8 }
 0x16f   : > { %p1243_p0 = pnand %p1246_p13, %p1422_p6 }
 0x171   : > { %p1244_p1 = pneg %p1243_p0 }
 0x173   : > { %1328 = dma.done.wait (%p1244_p1), %s801_s9, 64  }
 0x174   : > { %1330 = vsyncadd (%p1244_p1), %s801_s9, 4294967232  ;;  %p15_p2 = scmp.ge.s32.totalorder %s1405_s24, 4   ;;  %s1890_s18 = smov %s1337_s19 }
 0x175   : > { %s1891_s19 = smov %s1341_s20  ;;  %s1892_s20 = smov %s1416_s27 }
 0x176   : > { %s1893_s21 = smov %s1405_s24  ;;  %17 = sbr.rel (!%p15_p2) target bundleno = 3 (0x3), region = 81 }
 0x17b   :  { %806 = vsyncpa [#allocation3], 1 }
 0x17c   :  { %808 = vsyncpa [#allocation3 + $0x1], 1 }

</bundles_post_ra>
